<compile_context>
chip_gen: v6e
topology: v6e:2x2x1
jax: 0.10.0
libtpu: 0.0.40
codegen_flags: <defaults>
</compile_context>

<pallas_src>
import functools

import jax
import jax.numpy as jnp
from jax.experimental import pallas as pl
from jax.experimental.pallas import tpu as pltpu

_LANE = 128        # lane width: every feature dim padded to a multiple of this
_SUBLANE = 16      # bf16 sublane packing: batch tile is a multiple of 16


def _round_up(x, m):
    return ((x + m - 1) // m) * m


def _vmem_capacity_bytes():
    """Physical per-core VMEM (128 MiB v5e/v6e, 64 MiB v7x); safe fallback."""
    try:
        return int(pltpu.get_tpu_info().vmem_capacity_bytes)
    except Exception:
        return 64 << 20


# -----------------------------------------------------------------------------
# Kernel body: fc1 -> ReLU -> (dropout=id) -> fc2 -> ReLU -> (dropout=id) -> fc3
# -----------------------------------------------------------------------------
def _mlp_kernel(x_ref, w1_ref, b1_ref, w2_ref, b2_ref, w3_ref, b3_ref, o_ref):
    # bf16 operands on the MXU, f32 accumulation; epilogue (bias-add/ReLU) in
    # f32 (v5e's VPU has no bf16 path; epilogue hides under the MXU anyway).
    x = x_ref[...].astype(jnp.bfloat16)            # cheap in-kernel VPU cast

    h1 = jnp.dot(x, w1_ref[...], preferred_element_type=jnp.float32)
    h1 = jnp.maximum(h1 + b1_ref[...], 0.0)        # ReLU(fc1)
    # dropout1: identity at inference
    # TODO(synk): training-mode dropout mask via pltpu.prng_* if train parity is needed.

    h2 = jnp.dot(h1.astype(jnp.bfloat16), w2_ref[...],
                 preferred_element_type=jnp.float32)
    h2 = jnp.maximum(h2 + b2_ref[...], 0.0)        # ReLU(fc2)
    # dropout2: identity at inference

    out = jnp.dot(h2.astype(jnp.bfloat16), w3_ref[...],
                  preferred_element_type=jnp.float32)
    o_ref[...] = (out + b3_ref[...]).astype(o_ref.dtype)


# -----------------------------------------------------------------------------
# One-time parameter preparation (outside the per-call hot path)
# -----------------------------------------------------------------------------
def prepare_params(w1, b1, w2, b2, w3, b3):
    """Pad feature dims to 128 lanes and cast weights to bf16, biases to f32.

    Returns {"arrays": (w1p,b1p,w2p,b2p,w3p,b3p), "dims": (D_in,H1,H2,D_out)}.
    Call once; reuse for every forward so no weight pad/cast HBM pass per call.
    """
    d_in, h1 = w1.shape
    h2 = w2.shape[1]
    d_out = w3.shape[1]

    d_in_p, h1_p = _round_up(d_in, _LANE), _round_up(h1, _LANE)
    h2_p, d_out_p = _round_up(h2, _LANE), _round_up(d_out, _LANE)

    def padw(w, rows, cols):
        r, c = w.shape
        return jnp.pad(w.astype(jnp.bfloat16), ((0, rows - r), (0, cols - c)))

    def padb(b, cols):
        b = b.reshape(1, -1).astype(jnp.float32)
        return jnp.pad(b, ((0, 0), (0, cols - b.shape[1])))

    arrays = (padw(w1, d_in_p, h1_p), padb(b1, h1_p),
              padw(w2, h1_p, h2_p), padb(b2, h2_p),
              padw(w3, h2_p, d_out_p), padb(b3, d_out_p))
    return {"arrays": arrays, "dims": (int(d_in), int(h1), int(h2), int(d_out))}


# -----------------------------------------------------------------------------
# Forward
# -----------------------------------------------------------------------------
@functools.partial(
    jax.jit, static_argnames=("dims", "block_batch", "single_buffer_weights"))
def _mlp_forward_impl(x, w1p, b1p, w2p, b2p, w3p, b3p, *, dims, block_batch,
                      single_buffer_weights):
    d_in, h1, h2, d_out = dims
    B = x.shape[0]
    d_in_p, h1_p = w1p.shape
    h2_p = w2p.shape[1]
    d_out_p = w3p.shape[1]

    bb = block_batch
    b_p = _round_up(B, bb)
    grid = (b_p // bb,)

    # Pad x only when actually needed; otherwise pass it straight through in
    # f32 (bf16 cast happens in-kernel) -> no extra HBM pass over activations.
    if b_p != B or d_in_p != d_in:
        xk = jnp.pad(x.astype(jnp.bfloat16), ((0, b_p - B), (0, d_in_p - d_in)))
    else:
        xk = x

    const = lambda i: (0, 0)
    # Constant-index blocks never change between grid steps -> a second
    # pipeline buffer buys no overlap, only VMEM.  Single-buffer by default.
    w_kwargs = dict(pipeline_mode=pl.Buffered(1)) if single_buffer_weights else {}

    in_specs = [
        pl.BlockSpec((bb, d_in_p), lambda i: (i, 0)),         # x batch tile
        pl.BlockSpec((d_in_p, h1_p), const, **w_kwargs),      # W1 (VMEM-resident)
        pl.BlockSpec((1, h1_p), const, **w_kwargs),           # b1
        pl.BlockSpec((h1_p, h2_p), const, **w_kwargs),        # W2
        pl.BlockSpec((1, h2_p), const, **w_kwargs),           # b2
        pl.BlockSpec((h2_p, d_out_p), const, **w_kwargs),     # W3
        pl.BlockSpec((1, d_out_p), const, **w_kwargs),        # b3
    ]
    out_spec = pl.BlockSpec((bb, d_out_p), lambda i: (i, 0))

    # ---- VMEM budget, capped by physical capacity ---------------------------
    wbuf = 1 if single_buffer_weights else 2
    x_itemsize = xk.dtype.itemsize
    weight_vmem = wbuf * 2 * (d_in_p * h1_p + h1_p * h2_p + h2_p * d_out_p)
    bias_vmem = wbuf * 4 * (h1_p + h2_p + d_out_p)
    io_vmem = 2 * bb * (d_in_p * x_itemsize + d_out_p * 4)    # double-buffered x/out
    # f32 + bf16 copies of h1/h2 coexist around the pre-MXU casts (~6 B/elem).
    scratch_vmem = bb * (6 * h1_p + 6 * h2_p + 4 * d_out_p)
    vmem_limit = weight_vmem + bias_vmem + io_vmem + scratch_vmem + (8 << 20)
    vmem_cap = int(0.85 * _vmem_capacity_bytes())             # 64 MiB on v7x
    vmem_limit = max(16 << 20, min(vmem_limit, vmem_cap))

    # ---- Cost estimate from the true (unpadded) dims ------------------------
    flops = 2 * B * (d_in * h1 + h1 * h2 + h2 * d_out)
    bytes_accessed = (B * d_in * 4
                      + 2 * (d_in * h1 + h1 * h2 + h2 * d_out)
                      + 4 * (h1 + h2 + d_out)
                      + B * d_out * 4)
    cost = pl.CostEstimate(flops=int(flops), transcendentals=0,
                           bytes_accessed=int(bytes_accessed))

    out = pl.pallas_call(
        _mlp_kernel,
        out_shape=jax.ShapeDtypeStruct((b_p, d_out_p), jnp.float32),
        grid_spec=pltpu.PrefetchScalarGridSpec(
            num_scalar_prefetch=0,
            grid=grid,
            in_specs=in_specs,
            out_specs=out_spec,
        ),
        compiler_params=pltpu.CompilerParams(
            dimension_semantics=("parallel",),
            vmem_limit_bytes=int(vmem_limit),
        ),
        cost_estimate=cost,
    )(xk, w1p, b1p, w2p, b2p, w3p, b3p)

    # Slice only when padding was actually applied (skips the extra HBM copy
    # in the fully lane-/tile-aligned production case).
    if b_p != B or d_out_p != d_out:
        out = out[:B, :d_out]
    return out


def mlp_forward(x, params, *, block_batch=None):
    """x: [B, D_in] f32; params: output of prepare_params()."""
    arrays = params["arrays"]
    dims = params["dims"]
    B = int(x.shape[0])

    if block_batch is None:
        # Aim for >= 4 grid steps when B allows (keeps both v7x TCs busy and
        # overlaps x/out DMA with compute), with tiles >= 128 rows for the MXU
        # and <= 512 rows to amortize the ~0.35us/step overhead on v6e/v5e.
        block_batch = min(512, max(128, _round_up((B + 3) // 4, _SUBLANE)))
    bb = max(_SUBLANE, _round_up(min(int(block_batch), B), _SUBLANE))

    try:
        return _mlp_forward_impl(x, *arrays, dims=dims, block_batch=bb,
                                 single_buffer_weights=True)
    except Exception:
        # Fallback for toolchains that reject BlockSpec(pipeline_mode=Buffered(1)).
        return _mlp_forward_impl(x, *arrays, dims=dims, block_batch=bb,
                                 single_buffer_weights=False)


# -----------------------------------------------------------------------------
# Init + pure-JAX reference (eval-mode dropout)
# -----------------------------------------------------------------------------
def init_mlp_params(key, input_dim, hidden_dim1, hidden_dim2, output_dim):
    """PyTorch-style uniform(-1/sqrt(fan_in), 1/sqrt(fan_in)) init."""
    ks = jax.random.split(key, 6)

    def linear(kw, kb, fan_in, fan_out):
        bound = float(fan_in) ** -0.5
        w = jax.random.uniform(kw, (fan_in, fan_out), jnp.float32, -bound, bound)
        b = jax.random.uniform(kb, (1, fan_out), jnp.float32, -bound, bound)
        return w, b

    w1, b1 = linear(ks[0], ks[1], input_dim, hidden_dim1)
    w2, b2 = linear(ks[2], ks[3], hidden_dim1, hidden_dim2)
    w3, b3 = linear(ks[4], ks[5], hidden_dim2, output_dim)
    return w1, b1, w2, b2, w3, b3


def mlp_reference(x, w1, b1, w2, b2, w3, b3, matmul_dtype=jnp.float32):
    """Pure-JAX reference.  matmul_dtype=bf16 mirrors the kernel's bf16-operand
    / f32-accumulate arithmetic for a tight check."""
    def lin(a, w, b):
        return jnp.dot(a.astype(matmul_dtype), w.astype(matmul_dtype),
                       preferred_element_type=jnp.float32) + b

    h1 = jnp.maximum(lin(x, w1, b1), 0.0)
    h2 = jnp.maximum(lin(h1, w2, b2), 0.0)
    return lin(h2, w3, b3)


if __name__ == "__main__":
    # Small shapes consistent with MLP(input_dim, hidden_dim1, hidden_dim2, output_dim).
    batch = 64
    input_dim, hidden_dim1, hidden_dim2, output_dim = 32, 64, 48, 16

    key = jax.random.PRNGKey(0)
    kx, kp = jax.random.split(key)
    x = jax.random.normal(kx, (batch, input_dim), jnp.float32)
    raw = init_mlp_params(kp, input_dim, hidden_dim1, hidden_dim2, output_dim)

    params = prepare_params(*raw)          # one-time pad/cast, outside hot path
    out = mlp_forward(x, params)
    out = jax.block_until_ready(out)
    assert out.shape == (batch, output_dim), out.shape

    # Tight check vs a reference using the same bf16-operand / f32-accumulate math.
    ref_bf16 = mlp_reference(x, *raw, matmul_dtype=jnp.bfloat16)
    assert jnp.allclose(out, ref_bf16, atol=1e-3, rtol=1e-3), "mismatch vs bf16 reference"

    # Loose check vs the full-f32 reference (bf16 rounding tolerance).
    ref_f32 = mlp_reference(x, *raw, matmul_dtype=jnp.float32)
    assert jnp.allclose(out, ref_f32, atol=5e-2, rtol=5e-2), "mismatch vs f32 reference"

    print("KERNEL_OK")
</pallas_src>

<mosaic_0001>
module attributes {stable_mosaic.version = 11 : i64} {
  func.func @_mlp_kernel(%arg0: i32, %arg1: memref<64x128xbf16, #tpu.memory_space<vmem>>, %arg2: memref<128x128xbf16, #tpu.memory_space<vmem>>, %arg3: memref<1x128xf32, #tpu.memory_space<vmem>>, %arg4: memref<128x128xbf16, #tpu.memory_space<vmem>>, %arg5: memref<1x128xf32, #tpu.memory_space<vmem>>, %arg6: memref<128x128xbf16, #tpu.memory_space<vmem>>, %arg7: memref<1x128xf32, #tpu.memory_space<vmem>>, %arg8: memref<64x128xf32, #tpu.memory_space<vmem>>) attributes {dimension_semantics = [#tpu.dimension_semantics<parallel>], iteration_bounds = array<i64: 1>, scalar_prefetch = 0 : i64, scratch_operands = 0 : i64, tpu.core_type = #tpu.core_type<tc>, window_params = [{transform_indices = @transform_0, window_bounds = array<i64: 64, 128>}, {pipeline_mode = #tpu.pipeline_mode<synchronous>, transform_indices = @transform_1, window_bounds = array<i64: 128, 128>}, {pipeline_mode = #tpu.pipeline_mode<synchronous>, transform_indices = @transform_2, window_bounds = array<i64: 1, 128>}, {pipeline_mode = #tpu.pipeline_mode<synchronous>, transform_indices = @transform_3, window_bounds = array<i64: 128, 128>}, {pipeline_mode = #tpu.pipeline_mode<synchronous>, transform_indices = @transform_4, window_bounds = array<i64: 1, 128>}, {pipeline_mode = #tpu.pipeline_mode<synchronous>, transform_indices = @transform_5, window_bounds = array<i64: 128, 128>}, {pipeline_mode = #tpu.pipeline_mode<synchronous>, transform_indices = @transform_6, window_bounds = array<i64: 1, 128>}, {transform_indices = @transform_7, window_bounds = array<i64: 64, 128>}]} {
    %c0 = arith.constant 0 : index
    %c0_0 = arith.constant 0 : index
    %0 = vector.load %arg1[%c0, %c0_0] : memref<64x128xbf16, #tpu.memory_space<vmem>>, vector<64x128xbf16>
    %c0_1 = arith.constant 0 : index
    %c0_2 = arith.constant 0 : index
    %1 = vector.load %arg2[%c0_1, %c0_2] : memref<128x128xbf16, #tpu.memory_space<vmem>>, vector<128x128xbf16>
    %cst = arith.constant dense<0.000000e+00> : vector<64x128xf32>
    %2 = tpu.matmul %0, %1, %cst {dimension_numbers = #tpu.dot_dimension_numbers<[1], [0], [0], [1], [0, 0, 1, 1], [], []>} : vector<64x128xbf16>, vector<128x128xbf16>, vector<64x128xf32> -> vector<64x128xf32>
    %c0_3 = arith.constant 0 : index
    %c0_4 = arith.constant 0 : index
    %3 = vector.load %arg3[%c0_3, %c0_4] : memref<1x128xf32, #tpu.memory_space<vmem>>, vector<1x128xf32>
    %4 = vector.broadcast %3 : vector<1x128xf32> to vector<64x128xf32>
    %5 = arith.addf %2, %4 : vector<64x128xf32>
    %cst_5 = arith.constant 0.000000e+00 : f32
    %6 = vector.broadcast %cst_5 : f32 to vector<64x128xf32>
    %7 = arith.maximumf %5, %6 : vector<64x128xf32>
    %8 = arith.truncf %7 : vector<64x128xf32> to vector<64x128xbf16>
    %c0_6 = arith.constant 0 : index
    %c0_7 = arith.constant 0 : index
    %9 = vector.load %arg4[%c0_6, %c0_7] : memref<128x128xbf16, #tpu.memory_space<vmem>>, vector<128x128xbf16>
    %cst_8 = arith.constant dense<0.000000e+00> : vector<64x128xf32>
    %10 = tpu.matmul %8, %9, %cst_8 {dimension_numbers = #tpu.dot_dimension_numbers<[1], [0], [0], [1], [0, 0, 1, 1], [], []>} : vector<64x128xbf16>, vector<128x128xbf16>, vector<64x128xf32> -> vector<64x128xf32>
    %c0_9 = arith.constant 0 : index
    %c0_10 = arith.constant 0 : index
    %11 = vector.load %arg5[%c0_9, %c0_10] : memref<1x128xf32, #tpu.memory_space<vmem>>, vector<1x128xf32>
    %12 = vector.broadcast %11 : vector<1x128xf32> to vector<64x128xf32>
    %13 = arith.addf %10, %12 : vector<64x128xf32>
    %cst_11 = arith.constant 0.000000e+00 : f32
    %14 = vector.broadcast %cst_11 : f32 to vector<64x128xf32>
    %15 = arith.maximumf %13, %14 : vector<64x128xf32>
    %16 = arith.truncf %15 : vector<64x128xf32> to vector<64x128xbf16>
    %c0_12 = arith.constant 0 : index
    %c0_13 = arith.constant 0 : index
    %17 = vector.load %arg6[%c0_12, %c0_13] : memref<128x128xbf16, #tpu.memory_space<vmem>>, vector<128x128xbf16>
    %cst_14 = arith.constant dense<0.000000e+00> : vector<64x128xf32>
    %18 = tpu.matmul %16, %17, %cst_14 {dimension_numbers = #tpu.dot_dimension_numbers<[1], [0], [0], [1], [0, 0, 1, 1], [], []>} : vector<64x128xbf16>, vector<128x128xbf16>, vector<64x128xf32> -> vector<64x128xf32>
    %c0_15 = arith.constant 0 : index
    %c0_16 = arith.constant 0 : index
    %19 = vector.load %arg7[%c0_15, %c0_16] : memref<1x128xf32, #tpu.memory_space<vmem>>, vector<1x128xf32>
    %20 = vector.broadcast %19 : vector<1x128xf32> to vector<64x128xf32>
    %21 = arith.addf %18, %20 : vector<64x128xf32>
    %c0_17 = arith.constant 0 : index
    %c0_18 = arith.constant 0 : index
    %22 = vector.load %arg8[%c0_17, %c0_18] : memref<64x128xf32, #tpu.memory_space<vmem>>, vector<64x128xf32>
    tpu.vector_store %arg8[%c0_17, %c0_18], %21 {strides = array<i32>} : memref<64x128xf32, #tpu.memory_space<vmem>>, vector<64x128xf32>,
    return
  }
  func.func @transform_0(%arg0: i32) -> (i32, i32) {
    %c0_i32 = arith.constant 0 : i32
    %c0_i32_0 = arith.constant 0 : i32
    return %arg0, %c0_i32 : i32, i32
  }
  func.func @transform_1(%arg0: i32) -> (i32, i32) {
    %c0_i32 = arith.constant 0 : i32
    %c0_i32_0 = arith.constant 0 : i32
    %c0_i32_1 = arith.constant 0 : i32
    return %c0_i32, %c0_i32_0 : i32, i32
  }
  func.func @transform_2(%arg0: i32) -> (i32, i32) {
    %c0_i32 = arith.constant 0 : i32
    %c0_i32_0 = arith.constant 0 : i32
    %c0_i32_1 = arith.constant 0 : i32
    return %c0_i32, %c0_i32_0 : i32, i32
  }
  func.func @transform_3(%arg0: i32) -> (i32, i32) {
    %c0_i32 = arith.constant 0 : i32
    %c0_i32_0 = arith.constant 0 : i32
    %c0_i32_1 = arith.constant 0 : i32
    return %c0_i32, %c0_i32_0 : i32, i32
  }
  func.func @transform_4(%arg0: i32) -> (i32, i32) {
    %c0_i32 = arith.constant 0 : i32
    %c0_i32_0 = arith.constant 0 : i32
    %c0_i32_1 = arith.constant 0 : i32
    return %c0_i32, %c0_i32_0 : i32, i32
  }
  func.func @transform_5(%arg0: i32) -> (i32, i32) {
    %c0_i32 = arith.constant 0 : i32
    %c0_i32_0 = arith.constant 0 : i32
    %c0_i32_1 = arith.constant 0 : i32
    return %c0_i32, %c0_i32_0 : i32, i32
  }
  func.func @transform_6(%arg0: i32) -> (i32, i32) {
    %c0_i32 = arith.constant 0 : i32
    %c0_i32_0 = arith.constant 0 : i32
    %c0_i32_1 = arith.constant 0 : i32
    return %c0_i32, %c0_i32_0 : i32, i32
  }
  func.func @transform_7(%arg0: i32) -> (i32, i32) {
    %c0_i32 = arith.constant 0 : i32
    %c0_i32_0 = arith.constant 0 : i32
    return %arg0, %c0_i32 : i32, i32
  }
}

module attributes {stable_mosaic.version = 11 : i64} {
  func.func @_mlp_kernel(%arg0: i32, %arg1: memref<64x128xbf16, #tpu.memory_space<vmem>>, %arg2: memref<128x128xbf16, #tpu.memory_space<vmem>>, %arg3: memref<1x128xf32, #tpu.memory_space<vmem>>, %arg4: memref<128x128xbf16, #tpu.memory_space<vmem>>, %arg5: memref<1x128xf32, #tpu.memory_space<vmem>>, %arg6: memref<128x128xbf16, #tpu.memory_space<vmem>>, %arg7: memref<1x128xf32, #tpu.memory_space<vmem>>, %arg8: memref<64x128xf32, #tpu.memory_space<vmem>>) attributes {dimension_semantics = [#tpu.dimension_semantics<parallel>], iteration_bounds = array<i64: 1>, scalar_prefetch = 0 : i64, scratch_operands = 0 : i64, tpu.core_type = #tpu.core_type<tc>, window_params = [{transform_indices = @transform_0, window_bounds = array<i64: 64, 128>}, {pipeline_mode = #tpu.pipeline_mode<synchronous>, transform_indices = @transform_1, window_bounds = array<i64: 128, 128>}, {pipeline_mode = #tpu.pipeline_mode<synchronous>, transform_indices = @transform_2, window_bounds = array<i64: 1, 128>}, {pipeline_mode = #tpu.pipeline_mode<synchronous>, transform_indices = @transform_3, window_bounds = array<i64: 128, 128>}, {pipeline_mode = #tpu.pipeline_mode<synchronous>, transform_indices = @transform_4, window_bounds = array<i64: 1, 128>}, {pipeline_mode = #tpu.pipeline_mode<synchronous>, transform_indices = @transform_5, window_bounds = array<i64: 128, 128>}, {pipeline_mode = #tpu.pipeline_mode<synchronous>, transform_indices = @transform_6, window_bounds = array<i64: 1, 128>}, {transform_indices = @transform_7, window_bounds = array<i64: 64, 128>}]} {
    %c0 = arith.constant 0 : index
    %c0_0 = arith.constant 0 : index
    %0 = vector.load %arg1[%c0, %c0_0] : memref<64x128xbf16, #tpu.memory_space<vmem>>, vector<64x128xbf16>
    %c0_1 = arith.constant 0 : index
    %c0_2 = arith.constant 0 : index
    %1 = vector.load %arg2[%c0_1, %c0_2] : memref<128x128xbf16, #tpu.memory_space<vmem>>, vector<128x128xbf16>
    %cst = arith.constant dense<0.000000e+00> : vector<64x128xf32>
    %2 = tpu.matmul %0, %1, %cst {dimension_numbers = #tpu.dot_dimension_numbers<[1], [0], [0], [1], [0, 0, 1, 1], [], []>} : vector<64x128xbf16>, vector<128x128xbf16>, vector<64x128xf32> -> vector<64x128xf32>
    %c0_3 = arith.constant 0 : index
    %c0_4 = arith.constant 0 : index
    %3 = vector.load %arg3[%c0_3, %c0_4] : memref<1x128xf32, #tpu.memory_space<vmem>>, vector<1x128xf32>
    %4 = vector.broadcast %3 : vector<1x128xf32> to vector<64x128xf32>
    %5 = arith.addf %2, %4 : vector<64x128xf32>
    %cst_5 = arith.constant 0.000000e+00 : f32
    %6 = vector.broadcast %cst_5 : f32 to vector<64x128xf32>
    %7 = arith.maximumf %5, %6 : vector<64x128xf32>
    %8 = arith.truncf %7 : vector<64x128xf32> to vector<64x128xbf16>
    %c0_6 = arith.constant 0 : index
    %c0_7 = arith.constant 0 : index
    %9 = vector.load %arg4[%c0_6, %c0_7] : memref<128x128xbf16, #tpu.memory_space<vmem>>, vector<128x128xbf16>
    %cst_8 = arith.constant dense<0.000000e+00> : vector<64x128xf32>
    %10 = tpu.matmul %8, %9, %cst_8 {dimension_numbers = #tpu.dot_dimension_numbers<[1], [0], [0], [1], [0, 0, 1, 1], [], []>} : vector<64x128xbf16>, vector<128x128xbf16>, vector<64x128xf32> -> vector<64x128xf32>
    %c0_9 = arith.constant 0 : index
    %c0_10 = arith.constant 0 : index
    %11 = vector.load %arg5[%c0_9, %c0_10] : memref<1x128xf32, #tpu.memory_space<vmem>>, vector<1x128xf32>
    %12 = vector.broadcast %11 : vector<1x128xf32> to vector<64x128xf32>
    %13 = arith.addf %10, %12 : vector<64x128xf32>
    %cst_11 = arith.constant 0.000000e+00 : f32
    %14 = vector.broadcast %cst_11 : f32 to vector<64x128xf32>
    %15 = arith.maximumf %13, %14 : vector<64x128xf32>
    %16 = arith.truncf %15 : vector<64x128xf32> to vector<64x128xbf16>
    %c0_12 = arith.constant 0 : index
    %c0_13 = arith.constant 0 : index
    %17 = vector.load %arg6[%c0_12, %c0_13] : memref<128x128xbf16, #tpu.memory_space<vmem>>, vector<128x128xbf16>
    %cst_14 = arith.constant dense<0.000000e+00> : vector<64x128xf32>
    %18 = tpu.matmul %16, %17, %cst_14 {dimension_numbers = #tpu.dot_dimension_numbers<[1], [0], [0], [1], [0, 0, 1, 1], [], []>} : vector<64x128xbf16>, vector<128x128xbf16>, vector<64x128xf32> -> vector<64x128xf32>
    %c0_15 = arith.constant 0 : index
    %c0_16 = arith.constant 0 : index
    %19 = vector.load %arg7[%c0_15, %c0_16] : memref<1x128xf32, #tpu.memory_space<vmem>>, vector<1x128xf32>
    %20 = vector.broadcast %19 : vector<1x128xf32> to vector<64x128xf32>
    %21 = arith.addf %18, %20 : vector<64x128xf32>
    %c0_17 = arith.constant 0 : index
    %c0_18 = arith.constant 0 : index
    %22 = vector.load %arg8[%c0_17, %c0_18] : memref<64x128xf32, #tpu.memory_space<vmem>>, vector<64x128xf32>
    tpu.vector_store %arg8[%c0_17, %c0_18], %21 {strides = array<i32>} : memref<64x128xf32, #tpu.memory_space<vmem>>, vector<64x128xf32>,
    return
  }
  func.func @transform_0(%arg0: i32) -> (i32, i32) {
    %c0_i32 = arith.constant 0 : i32
    %c0_i32_0 = arith.constant 0 : i32
    return %arg0, %c0_i32 : i32, i32
  }
  func.func @transform_1(%arg0: i32) -> (i32, i32) {
    %c0_i32 = arith.constant 0 : i32
    %c0_i32_0 = arith.constant 0 : i32
    %c0_i32_1 = arith.constant 0 : i32
    return %c0_i32, %c0_i32_0 : i32, i32
  }
  func.func @transform_2(%arg0: i32) -> (i32, i32) {
    %c0_i32 = arith.constant 0 : i32
    %c0_i32_0 = arith.constant 0 : i32
    %c0_i32_1 = arith.constant 0 : i32
    return %c0_i32, %c0_i32_0 : i32, i32
  }
  func.func @transform_3(%arg0: i32) -> (i32, i32) {
    %c0_i32 = arith.constant 0 : i32
    %c0_i32_0 = arith.constant 0 : i32
    %c0_i32_1 = arith.constant 0 : i32
    return %c0_i32, %c0_i32_0 : i32, i32
  }
  func.func @transform_4(%arg0: i32) -> (i32, i32) {
    %c0_i32 = arith.constant 0 : i32
    %c0_i32_0 = arith.constant 0 : i32
    %c0_i32_1 = arith.constant 0 : i32
    return %c0_i32, %c0_i32_0 : i32, i32
  }
  func.func @transform_5(%arg0: i32) -> (i32, i32) {
    %c0_i32 = arith.constant 0 : i32
    %c0_i32_0 = arith.constant 0 : i32
    %c0_i32_1 = arith.constant 0 : i32
    return %c0_i32, %c0_i32_0 : i32, i32
  }
  func.func @transform_6(%arg0: i32) -> (i32, i32) {
    %c0_i32 = arith.constant 0 : i32
    %c0_i32_0 = arith.constant 0 : i32
    %c0_i32_1 = arith.constant 0 : i32
    return %c0_i32, %c0_i32_0 : i32, i32
  }
  func.func @transform_7(%arg0: i32) -> (i32, i32) {
    %c0_i32 = arith.constant 0 : i32
    %c0_i32_0 = arith.constant 0 : i32
    return %arg0, %c0_i32 : i32, i32
  }
}

</mosaic_0001>

<bundles_post_ra>
// kernel: _mlp_forward_impl.1
= control target key start
LH: loop header
LB: loop body
LE: loop exit
PB: predicated region body
PF: predicated region fallthrough
CT: control target
= control target key end

     0   :  { %12 = vsyncpa [#allocation3], 0  ;;  %s726_s24 = smov [#allocation2]   ;;  %s865_s0 = inlined_call_operand.vmem [shape: bf16[64,128], index: 0, kind: input, shape index: {}]   ;;  %s866_s1 = inlined_call_operand.vmem [shape: bf16[128,128], index: 1, kind: input, shape index: {}]   ;;  %s867_s2 = inlined_call_operand.vmem [shape: f32[1,128], index: 2, kind: input, shape index: {}]   ;;  %s868_s3 = inlined_call_operand.vmem [shape: bf16[128,128], index: 3, kind: input, shape index: {}]   ;;  %s869_s4 = inlined_call_operand.vmem [shape: f32[1,128], index: 4, kind: input, shape index: {}]   ;;  %s870_s5 = inlined_call_operand.hbm [shape: bf16[128,128], index: 5, kind: input, shape index: {}]   ;;  %s871_s6 = inlined_call_operand.vmem [shape: f32[1,128], index: 6, kind: input, shape index: {}]   ;;  %s872_s7 = inlined_call_operand.vmem [shape: f32[64,128], index: 7, kind: output, shape index: {}]  }
   0x1   :  { %s28_s25 = sshll.u32 %s726_s24, 4  ;;  %s29_s25 = int_to_ptr.vmem [resolvable:$true] %s28_s25 }
   0x2   :  { %s712_s26 = scalar_lea.vmem %s29_s25, 1024  ;;  %p717_p1 = scmp.lt.s32.totalorder %s29_s25, %s29_s25 }
   0x3   :  { %p713_p0 = scmp.ne.s32.totalorder %s29_s25, %s712_s26  ;;  %p718_p2 = scmp.lt.s32.totalorder %s712_s26, %s712_s26 }
   0x5   :  { %p719_p3 = por %p718_p2, %p717_p1 }
   0x7   :  { %p720_p4 = pnand %p719_p3, %p713_p0 }
   0x9   :  { %723 = shalt.err (!%p720_p4)
}
   0xa   :  { %s727_s27 = smov 64   ;;  %s728_s28 = smov 4  }
   0xb   :  { %34 = dma.hbm_to_vmem [thread:$0]  %s870_s5, 1024, %s29_s25, [#allocation3], %s727_s27, %s727_s27, %s728_s28  }
   0xc   :  { %724 = dma.done.wait [#allocation3], 1024  }
   0xd   :  { %725 = vsyncadd [#allocation3], 4294966272  ;;  %v676_v0 = vld [vmem:[%s866_s1 + $0x38] sm:$0xff]   ;;  %v677_v1 = vld [vmem:[%s866_s1 + $0x30] sm:$0xff]  }
   0xe   :  { %585 = vmatprep.subr.bf16.mxu0 %v676_v0  ;;  %v678_v2 = vld [vmem:[%s866_s1 + $0x28] sm:$0xff]   ;;  %v679_v3 = vld [vmem:[%s866_s1 + $0x20] sm:$0xff]   ;;  %v680_v5 = vld [vmem:[%s866_s1 + $0x18] sm:$0xff]  }
   0xf   :  { %586 = vmatpush3.bf16.msra.mxu0 %v676_v0  ;;  %v684_v4 = vld [vmem:[%s865_s0] sm:$0xff]   ;;  %v688_v6 = vld [vmem:[%s868_s3 + $0x38] sm:$0xff]   ;;  %v689_v7 = vld [vmem:[%s868_s3 + $0x30] sm:$0xff]  }
  0x10   :  { %587 = vmatprep.subr.bf16.mxu0 %v677_v1  ;;  %601 = vmatprep.mubr.bf16.mxu0 %v684_v4  ;;  %v681_v8 = vld [vmem:[%s866_s1 + $0x10] sm:$0xff]   ;;  %v690_v9 = vld [vmem:[%s868_s3 + $0x28] sm:$0xff]   ;;  %v691_v11 = vld [vmem:[%s868_s3 + $0x20] sm:$0xff]  }
  0x11   :  { %609 = vmatprep.subr.bf16.mxu1 %v688_v6  ;;  %v682_v10 = vld [vmem:[%s866_s1 + $0x8] sm:$0xff]   ;;  %v683_v12 = vld [vmem:[%s866_s1] sm:$0xff]   ;;  %v692_v13 = vld [vmem:[%s868_s3 + $0x18] sm:$0xff]  }
  0x12   :  { %610 = vmatpush3.bf16.msra.mxu1 %v688_v6  ;;  %v685_v14 = vld [vmem:[%s865_s0 + $0x8] sm:$0xff]   ;;  %v686_v15 = vld [vmem:[%s865_s0 + $0x10] sm:$0xff]   ;;  %v687_v16 = vld [vmem:[%s865_s0 + $0x18] sm:$0xff]  }
  0x13   :  { %588 = vmatpush3.bf16.msra.mxu0 %v677_v1  ;;  %611 = vmatprep.subr.bf16.mxu1 %v689_v7  ;;  %v693_v17 = vld [vmem:[%s868_s3 + $0x10] sm:$0xff]   ;;  %v694_v18 = vld [vmem:[%s868_s3 + $0x8] sm:$0xff]   ;;  %v695_v19 = vld [vmem:[%s868_s3] sm:$0xff]  }
  0x14   :  { %589 = vmatprep.subr.bf16.mxu0 %v678_v2  ;;  %v696_v20 = vld [vmem:[#allocation2 + $0x38] sm:$0xff]   ;;  %v697_v21 = vld [vmem:[#allocation2 + $0x30] sm:$0xff]   ;;  %v698_v22 = vld [vmem:[#allocation2 + $0x28] sm:$0xff]  }
  0x15   :  { %v699_v23 = vld [vmem:[#allocation2 + $0x20] sm:$0xff]   ;;  %v700_v24 = vld [vmem:[#allocation2 + $0x18] sm:$0xff]   ;;  %v701_v54 = vld [vmem:[#allocation2 + $0x10] sm:$0xff]  }
  0x16   :  { %612 = vmatpush3.bf16.msra.mxu1 %v689_v7  ;;  %v518_v27 = vld [vmem:[%s867_s2] ss:$0 sm:$0xff]  ;;  %v702_v55 = vld [vmem:[#allocation2 + $0x8] sm:$0xff]  }
  0x17   :  { %590 = vmatpush3.bf16.msra.mxu0 %v678_v2  ;;  %613 = vmatprep.subr.bf16.mxu1 %v690_v9  ;;  %v703_v56 = vld [vmem:[#allocation2] sm:$0xff]  }
  0x18   :  { %591 = vmatprep.subr.bf16.mxu0 %v679_v3  ;;  %v531_v59 = vld [vmem:[%s869_s4] ss:$0 sm:$0xff] }
  0x1a   :  { %614 = vmatpush3.bf16.msra.mxu1 %v690_v9 }
  0x1b   :  { %592 = vmatpush3.bf16.msra.mxu0 %v679_v3  ;;  %615 = vmatprep.subr.bf16.mxu1 %v691_v11 }
  0x1c   :  { %593 = vmatprep.subr.bf16.mxu0 %v680_v5 }
  0x1e   :  { %616 = vmatpush3.bf16.msra.mxu1 %v691_v11 }
  0x1f   :  { %594 = vmatpush3.bf16.msra.mxu0 %v680_v5  ;;  %617 = vmatprep.subr.bf16.mxu1 %v692_v13 }
  0x20   :  { %595 = vmatprep.subr.bf16.mxu0 %v681_v8 }
  0x22   :  { %618 = vmatpush3.bf16.msra.mxu1 %v692_v13 }
  0x23   :  { %596 = vmatpush3.bf16.msra.mxu0 %v681_v8  ;;  %619 = vmatprep.subr.bf16.mxu1 %v693_v17 }
  0x24   :  { %597 = vmatprep.subr.bf16.mxu0 %v682_v10 }
  0x26   :  { %620 = vmatpush3.bf16.msra.mxu1 %v693_v17 }
  0x27   :  { %598 = vmatpush3.bf16.msra.mxu0 %v682_v10  ;;  %621 = vmatprep.subr.bf16.mxu1 %v694_v18 }
  0x28   :  { %599 = vmatprep.subr.bf16.mxu0 %v683_v12 }
  0x2a   :  { %622 = vmatpush3.bf16.msra.mxu1 %v694_v18 }
  0x2b   :  { %600 = vmatpush3.bf16.msra.mxu0 %v683_v12  ;;  %623 = vmatprep.subr.bf16.mxu1 %v695_v19 }
  0x2c   :  { %633 = vmatprep.subr.bf16.mxu0 %v696_v20 }
  0x2e   :  { %602 = vmatmul.mubr.bf16.vlgmr.msra.gmra.mxu0 %v685_v14  ;;  %624 = vmatpush3.bf16.msra.mxu1 %v695_v19 }
  0x2f   :  { %605 = vmatprep.mubr.bf16.mxu0 %v686_v15  ;;  %657 = vmatprep.subr.bf16.mxu1 %v696_v20 }
  0x30   :  { %634 = vmatpush3.bf16.msra.mxu0 %v696_v20 }
  0x31   :  { %635 = vmatprep.subr.bf16.mxu0 %v697_v21 }
  0x34   :  { %636 = vmatpush3.bf16.msra.mxu0 %v697_v21 }
  0x35   :  { %637 = vmatprep.subr.bf16.mxu0 %v698_v22 }
  0x36   :  { %606 = vmatmul.mubr.bf16.gmra.mxu0 %v687_v16 }
  0x38   :  { %638 = vmatpush3.bf16.msra.mxu0 %v698_v22 }
  0x39   :  { %639 = vmatprep.subr.bf16.mxu0 %v699_v23 }
  0x3c   :  { %640 = vmatpush3.bf16.msra.mxu0 %v699_v23 }
  0x3d   :  { %641 = vmatprep.subr.bf16.mxu0 %v700_v24 }
  0x40   :  { %642 = vmatpush3.bf16.msra.mxu0 %v700_v24 }
  0x41   :  { %643 = vmatprep.subr.bf16.mxu0 %v701_v54 }
  0x44   :  { %644 = vmatpush3.bf16.msra.mxu0 %v701_v54 }
  0x45   :  { %645 = vmatprep.subr.bf16.mxu0 %v702_v55 }
  0x48   :  { %646 = vmatpush3.bf16.msra.mxu0 %v702_v55 }
  0x49   :  { %647 = vmatprep.subr.bf16.mxu0 %v703_v56 }
  0x4c   :  { %648 = vmatpush3.bf16.msra.mxu0 %v703_v56 }
  0xee   :  { %v603_v25 = vpop.f32.mrf.mxu0 }
  0xef   :  { %v187_v31 = vadd.f32 %v603_v25, %v518_v27 }
  0xf0   :  { %v178_v26 = vpop.f32.mrf.mxu0 }
  0xf1   :  { %v179_v29 = vadd.f32 %v518_v27, %v178_v26  ;;  %v211_v38 = vmax.f32 %v187_v31, 0.0 }
  0xf2   :  { %v604_v28 = vpop.f32.mrf.mxu0 }
  0xf3   :  { %v190_v30 = vadd.f32 %v604_v28, %v518_v27  ;;  %v209_v36 = vmax.f32 %v179_v29, 0.0 }
  0xf4   :  { %v181_v32 = vpop.f32.mrf.mxu0 }
  0xf5   :  { %v182_v33 = vadd.f32 %v518_v27, %v181_v32  ;;  %v212_v34 = vmax.f32 %v190_v30, 0.0 }
  0xf6   :  { %v607_v35 = vpop.f32.mrf.mxu0 }
  0xf7   :  { %v210_v37 = vmax.f32 %v182_v33, 0.0  ;;  %v218_v41 = vpack.c.bf16 %v212_v34, %v211_v38  ;;  %v203_v45 = vadd.f32 %v607_v35, %v518_v27 }
  0xf8   :  { %v194_v39 = vpop.f32.mrf.mxu0 }
  0xf9   :  { %v217_v40 = vpack.c.bf16 %v210_v37, %v209_v36  ;;  %v195_v43 = vadd.f32 %v518_v27, %v194_v39  ;;  %v215_v51 = vmax.f32 %v203_v45, 0.0 }
  0xfa   :  { %v608_v42 = vpop.f32.mrf.mxu0 }
  0xfb   :  { %v206_v44 = vadd.f32 %v608_v42, %v518_v27  ;;  %625 = vmatprep.mubr.bf16.mxu1 %v217_v40  ;;  %v213_v49 = vmax.f32 %v195_v43, 0.0 }
  0xfc   :  { %v197_v46 = vpop.f32.mrf.mxu0  ;;  %626 = vmatmul.mubr.bf16.vlgmr.msra.gmra.mxu1 %v218_v41 }
  0xfd   :  { %v198_v47 = vadd.f32 %v518_v27, %v197_v46  ;;  %665 = vmatpush3.bf16.msra.mxu1 %v696_v20  ;;  %v216_v48 = vmax.f32 %v206_v44, 0.0 }
  0xfe   :  { %658 = vmatprep.subr.bf16.mxu1 %v697_v21 }
  0xff   :  { %v214_v50 = vmax.f32 %v198_v47, 0.0  ;;  %v220_v53 = vpack.c.bf16 %v216_v48, %v215_v51 }
 0x101   :  { %v219_v52 = vpack.c.bf16 %v214_v50, %v213_v49  ;;  %666 = vmatpush3.bf16.msra.mxu1 %v697_v21 }
 0x102   :  { %659 = vmatprep.subr.bf16.mxu1 %v698_v22 }
 0x103   :  { %629 = vmatprep.mubr.bf16.mxu1 %v219_v52 }
 0x104   :  { %630 = vmatmul.mubr.bf16.gmra.mxu1 %v220_v53 }
 0x105   :  { %667 = vmatpush3.bf16.msra.mxu1 %v698_v22  ;;  %v540_v22 = vld [vmem:[%s871_s6] ss:$0 sm:$0xff] }
 0x106   :  { %660 = vmatprep.subr.bf16.mxu1 %v699_v23 }
 0x109   :  { %668 = vmatpush3.bf16.msra.mxu1 %v699_v23 }
 0x10a   :  { %661 = vmatprep.subr.bf16.mxu1 %v700_v24 }
 0x10d   :  { %669 = vmatpush3.bf16.msra.mxu1 %v700_v24 }
 0x10e   :  { %662 = vmatprep.subr.bf16.mxu1 %v701_v54 }
 0x111   :  { %670 = vmatpush3.bf16.msra.mxu1 %v701_v54 }
 0x112   :  { %663 = vmatprep.subr.bf16.mxu1 %v702_v55 }
 0x115   :  { %671 = vmatpush3.bf16.msra.mxu1 %v702_v55 }
 0x116   :  { %664 = vmatprep.subr.bf16.mxu1 %v703_v56 }
 0x119   :  { %672 = vmatpush3.bf16.msra.mxu1 %v703_v56 }
 0x1bc   :  { %v627_v57 = vpop.f32.mrf.mxu1 }
 0x1bd   :  { %v335_v63 = vadd.f32 %v627_v57, %v531_v59 }
 0x1be   :  { %v326_v58 = vpop.f32.mrf.mxu1 }
 0x1bf   :  { %v327_v61 = vadd.f32 %v531_v59, %v326_v58  ;;  %v359_v6 = vmax.f32 %v335_v63, 0.0 }
 0x1c0   :  { %v628_v60 = vpop.f32.mrf.mxu1 }
 0x1c1   :  { %v338_v62 = vadd.f32 %v628_v60, %v531_v59  ;;  %v357_v4 = vmax.f32 %v327_v61, 0.0 }
 0x1c2   :  { %v329_v0 = vpop.f32.mrf.mxu1 }
 0x1c3   :  { %v330_v1 = vadd.f32 %v531_v59, %v329_v0  ;;  %v360_v2 = vmax.f32 %v338_v62, 0.0 }
 0x1c4   :  { %v631_v3 = vpop.f32.mrf.mxu1 }
 0x1c5   :  { %v358_v5 = vmax.f32 %v330_v1, 0.0  ;;  %v366_v9 = vpack.c.bf16 %v360_v2, %v359_v6  ;;  %v351_v13 = vadd.f32 %v631_v3, %v531_v59 }
 0x1c6   :  { %v342_v7 = vpop.f32.mrf.mxu1 }
 0x1c7   :  { %v365_v8 = vpack.c.bf16 %v358_v5, %v357_v4  ;;  %v343_v11 = vadd.f32 %v531_v59, %v342_v7  ;;  %v363_v19 = vmax.f32 %v351_v13, 0.0 }
 0x1c8   :  { %v632_v10 = vpop.f32.mrf.mxu1 }
 0x1c9   :  { %v354_v12 = vadd.f32 %v632_v10, %v531_v59  ;;  %649 = vmatprep.mubr.bf16.mxu0 %v365_v8  ;;  %v361_v17 = vmax.f32 %v343_v11, 0.0 }
 0x1ca   :  { %v345_v14 = vpop.f32.mrf.mxu1  ;;  %650 = vmatmul.mubr.bf16.vlgmr.msra.gmra.mxu0 %v366_v9 }
 0x1cb   :  { %v346_v15 = vadd.f32 %v531_v59, %v345_v14  ;;  %v364_v16 = vmax.f32 %v354_v12, 0.0 }
 0x1cd   :  { %v362_v18 = vmax.f32 %v346_v15, 0.0  ;;  %v368_v21 = vpack.c.bf16 %v364_v16, %v363_v19 }
 0x1cf   :  { %v367_v20 = vpack.c.bf16 %v362_v18, %v361_v17 }
 0x1d1   :  { %653 = vmatprep.mubr.bf16.mxu1 %v367_v20 }
 0x1d2   :  { %654 = vmatmul.mubr.bf16.vlgmr.msra.gmra.mxu1 %v368_v21 }
 0x28a   :  { %v651_v23 = vpop.f32.mrf.mxu0 }
 0x28b   :  { %v483_v24 = vadd.f32 %v651_v23, %v540_v22 }
 0x28c   :  { %v474_v25 = vpop.f32.mrf.mxu0 }
 0x28d   :  { %507 = vst [vmem:[%s872_s7 + $0x10] sm:$0xff] %v483_v24  ;;  %v475_v26 = vadd.f32 %v540_v22, %v474_v25 }
 0x28e   :  { %v652_v27 = vpop.f32.mrf.mxu0 }
 0x28f   :  { %505 = vst [vmem:[%s872_s7] sm:$0xff] %v475_v26  ;;  %v486_v28 = vadd.f32 %v652_v27, %v540_v22 }
 0x290   :  { %v477_v29 = vpop.f32.mrf.mxu0 }
 0x291   :  { %508 = vst [vmem:[%s872_s7 + $0x18] sm:$0xff] %v486_v28  ;;  %v478_v30 = vadd.f32 %v540_v22, %v477_v29 }
 0x292   :  { %v655_v31 = vpop.f32.mrf.mxu1 }
 0x293   :  { %506 = vst [vmem:[%s872_s7 + $0x8] sm:$0xff] %v478_v30  ;;  %v499_v32 = vadd.f32 %v655_v31, %v540_v22 }
 0x294   :  { %v490_v33 = vpop.f32.mrf.mxu1 }
 0x295   :  { %511 = vst [vmem:[%s872_s7 + $0x30] sm:$0xff] %v499_v32  ;;  %v491_v34 = vadd.f32 %v540_v22, %v490_v33 }
 0x296   :  { %v656_v35 = vpop.f32.mrf.mxu1 }
 0x297   :  { %509 = vst [vmem:[%s872_s7 + $0x20] sm:$0xff] %v491_v34  ;;  %v502_v36 = vadd.f32 %v656_v35, %v540_v22 }
 0x298   :  { %v493_v37 = vpop.f32.mrf.mxu1 }
 0x299   :  { %512 = vst [vmem:[%s872_s7 + $0x38] sm:$0xff] %v502_v36  ;;  %v494_v38 = vadd.f32 %v540_v22, %v493_v37 }
 0x29b   :  { %510 = vst [vmem:[%s872_s7 + $0x28] sm:$0xff] %v494_v38 }
 0x29c   :  { %517 = vsyncpa [#allocation3], 1 }

// kernel: _mlp_forward_impl.1
= control target key start
LH: loop header
LB: loop body
LE: loop exit
PB: predicated region body
PF: predicated region fallthrough
CT: control target
= control target key end

     0   :  { %12 = vsyncpa [#allocation3], 0  ;;  %s726_s24 = smov [#allocation2]   ;;  %s865_s0 = inlined_call_operand.vmem [shape: bf16[64,128], index: 0, kind: input, shape index: {}]   ;;  %s866_s1 = inlined_call_operand.vmem [shape: bf16[128,128], index: 1, kind: input, shape index: {}]   ;;  %s867_s2 = inlined_call_operand.vmem [shape: f32[1,128], index: 2, kind: input, shape index: {}]   ;;  %s868_s3 = inlined_call_operand.vmem [shape: bf16[128,128], index: 3, kind: input, shape index: {}]   ;;  %s869_s4 = inlined_call_operand.vmem [shape: f32[1,128], index: 4, kind: input, shape index: {}]   ;;  %s870_s5 = inlined_call_operand.hbm [shape: bf16[128,128], index: 5, kind: input, shape index: {}]   ;;  %s871_s6 = inlined_call_operand.vmem [shape: f32[1,128], index: 6, kind: input, shape index: {}]   ;;  %s872_s7 = inlined_call_operand.vmem [shape: f32[64,128], index: 7, kind: output, shape index: {}]  }
   0x1   :  { %s28_s25 = sshll.u32 %s726_s24, 4  ;;  %s29_s25 = int_to_ptr.vmem [resolvable:$true] %s28_s25 }
   0x2   :  { %s712_s26 = scalar_lea.vmem %s29_s25, 1024  ;;  %p717_p1 = scmp.lt.s32.totalorder %s29_s25, %s29_s25 }
   0x3   :  { %p713_p0 = scmp.ne.s32.totalorder %s29_s25, %s712_s26  ;;  %p718_p2 = scmp.lt.s32.totalorder %s712_s26, %s712_s26 }
   0x5   :  { %p719_p3 = por %p718_p2, %p717_p1 }
   0x7   :  { %p720_p4 = pnand %p719_p3, %p713_p0 }
   0x9   :  { %723 = shalt.err (!%p720_p4)
}
   0xa   :  { %s727_s27 = smov 64   ;;  %s728_s28 = smov 4  }
   0xb   :  { %34 = dma.hbm_to_vmem [thread:$0]  %s870_s5, 1024, %s29_s25, [#allocation3], %s727_s27, %s727_s27, %s728_s28  }
   0xc   :  { %724 = dma.done.wait [#allocation3], 1024  }
   0xd   :  { %725 = vsyncadd [#allocation3], 4294966272  ;;  %v676_v0 = vld [vmem:[%s866_s1 + $0x38] sm:$0xff]   ;;  %v677_v1 = vld [vmem:[%s866_s1 + $0x30] sm:$0xff]  }
   0xe   :  { %585 = vmatprep.subr.bf16.mxu0 %v676_v0  ;;  %v678_v2 = vld [vmem:[%s866_s1 + $0x28] sm:$0xff]   ;;  %v679_v3 = vld [vmem:[%s866_s1 + $0x20] sm:$0xff]   ;;  %v680_v5 = vld [vmem:[%s866_s1 + $0x18] sm:$0xff]  }
   0xf   :  { %586 = vmatpush3.bf16.msra.mxu0 %v676_v0  ;;  %v684_v4 = vld [vmem:[%s865_s0] sm:$0xff]   ;;  %v688_v6 = vld [vmem:[%s868_s3 + $0x38] sm:$0xff]   ;;  %v689_v7 = vld [vmem:[%s868_s3 + $0x30] sm:$0xff]  }
  0x10   :  { %587 = vmatprep.subr.bf16.mxu0 %v677_v1  ;;  %601 = vmatprep.mubr.bf16.mxu0 %v684_v4  ;;  %v681_v8 = vld [vmem:[%s866_s1 + $0x10] sm:$0xff]   ;;  %v690_v9 = vld [vmem:[%s868_s3 + $0x28] sm:$0xff]   ;;  %v691_v11 = vld [vmem:[%s868_s3 + $0x20] sm:$0xff]  }
  0x11   :  { %609 = vmatprep.subr.bf16.mxu1 %v688_v6  ;;  %v682_v10 = vld [vmem:[%s866_s1 + $0x8] sm:$0xff]   ;;  %v683_v12 = vld [vmem:[%s866_s1] sm:$0xff]   ;;  %v692_v13 = vld [vmem:[%s868_s3 + $0x18] sm:$0xff]  }
  0x12   :  { %610 = vmatpush3.bf16.msra.mxu1 %v688_v6  ;;  %v685_v14 = vld [vmem:[%s865_s0 + $0x8] sm:$0xff]   ;;  %v686_v15 = vld [vmem:[%s865_s0 + $0x10] sm:$0xff]   ;;  %v687_v16 = vld [vmem:[%s865_s0 + $0x18] sm:$0xff]  }
  0x13   :  { %588 = vmatpush3.bf16.msra.mxu0 %v677_v1  ;;  %611 = vmatprep.subr.bf16.mxu1 %v689_v7  ;;  %v693_v17 = vld [vmem:[%s868_s3 + $0x10] sm:$0xff]   ;;  %v694_v18 = vld [vmem:[%s868_s3 + $0x8] sm:$0xff]   ;;  %v695_v19 = vld [vmem:[%s868_s3] sm:$0xff]  }
  0x14   :  { %589 = vmatprep.subr.bf16.mxu0 %v678_v2  ;;  %v696_v20 = vld [vmem:[#allocation2 + $0x38] sm:$0xff]   ;;  %v697_v21 = vld [vmem:[#allocation2 + $0x30] sm:$0xff]   ;;  %v698_v22 = vld [vmem:[#allocation2 + $0x28] sm:$0xff]  }
  0x15   :  { %v699_v23 = vld [vmem:[#allocation2 + $0x20] sm:$0xff]   ;;  %v700_v24 = vld [vmem:[#allocation2 + $0x18] sm:$0xff]   ;;  %v701_v54 = vld [vmem:[#allocation2 + $0x10] sm:$0xff]  }
  0x16   :  { %612 = vmatpush3.bf16.msra.mxu1 %v689_v7  ;;  %v518_v27 = vld [vmem:[%s867_s2] ss:$0 sm:$0xff]  ;;  %v702_v55 = vld [vmem:[#allocation2 + $0x8] sm:$0xff]  }
  0x17   :  { %590 = vmatpush3.bf16.msra.mxu0 %v678_v2  ;;  %613 = vmatprep.subr.bf16.mxu1 %v690_v9  ;;  %v703_v56 = vld [vmem:[#allocation2] sm:$0xff]  }
  0x18   :  { %591 = vmatprep.subr.bf16.mxu0 %v679_v3  ;;  %v531_v59 = vld [vmem:[%s869_s4] ss:$0 sm:$0xff] }
  0x1a   :  { %614 = vmatpush3.bf16.msra.mxu1 %v690_v9 }
  0x1b   :  { %592 = vmatpush3.bf16.msra.mxu0 %v679_v3  ;;  %615 = vmatprep.subr.bf16.mxu1 %v691_v11 }
  0x1c   :  { %593 = vmatprep.subr.bf16.mxu0 %v680_v5 }
  0x1e   :  { %616 = vmatpush3.bf16.msra.mxu1 %v691_v11 }
  0x1f   :  { %594 = vmatpush3.bf16.msra.mxu0 %v680_v5  ;;  %617 = vmatprep.subr.bf16.mxu1 %v692_v13 }
  0x20   :  { %595 = vmatprep.subr.bf16.mxu0 %v681_v8 }
  0x22   :  { %618 = vmatpush3.bf16.msra.mxu1 %v692_v13 }
  0x23   :  { %596 = vmatpush3.bf16.msra.mxu0 %v681_v8  ;;  %619 = vmatprep.subr.bf16.mxu1 %v693_v17 }
  0x24   :  { %597 = vmatprep.subr.bf16.mxu0 %v682_v10 }
  0x26   :  { %620 = vmatpush3.bf16.msra.mxu1 %v693_v17 }
  0x27   :  { %598 = vmatpush3.bf16.msra.mxu0 %v682_v10  ;;  %621 = vmatprep.subr.bf16.mxu1 %v694_v18 }
  0x28   :  { %599 = vmatprep.subr.bf16.mxu0 %v683_v12 }
  0x2a   :  { %622 = vmatpush3.bf16.msra.mxu1 %v694_v18 }
  0x2b   :  { %600 = vmatpush3.bf16.msra.mxu0 %v683_v12  ;;  %623 = vmatprep.subr.bf16.mxu1 %v695_v19 }
  0x2c   :  { %633 = vmatprep.subr.bf16.mxu0 %v696_v20 }
  0x2e   :  { %602 = vmatmul.mubr.bf16.vlgmr.msra.gmra.mxu0 %v685_v14  ;;  %624 = vmatpush3.bf16.msra.mxu1 %v695_v19 }
  0x2f   :  { %605 = vmatprep.mubr.bf16.mxu0 %v686_v15  ;;  %657 = vmatprep.subr.bf16.mxu1 %v696_v20 }
  0x30   :  { %634 = vmatpush3.bf16.msra.mxu0 %v696_v20 }
  0x31   :  { %635 = vmatprep.subr.bf16.mxu0 %v697_v21 }
  0x34   :  { %636 = vmatpush3.bf16.msra.mxu0 %v697_v21 }
  0x35   :  { %637 = vmatprep.subr.bf16.mxu0 %v698_v22 }
  0x36   :  { %606 = vmatmul.mubr.bf16.gmra.mxu0 %v687_v16 }
  0x38   :  { %638 = vmatpush3.bf16.msra.mxu0 %v698_v22 }
  0x39   :  { %639 = vmatprep.subr.bf16.mxu0 %v699_v23 }
  0x3c   :  { %640 = vmatpush3.bf16.msra.mxu0 %v699_v23 }
  0x3d   :  { %641 = vmatprep.subr.bf16.mxu0 %v700_v24 }
  0x40   :  { %642 = vmatpush3.bf16.msra.mxu0 %v700_v24 }
  0x41   :  { %643 = vmatprep.subr.bf16.mxu0 %v701_v54 }
  0x44   :  { %644 = vmatpush3.bf16.msra.mxu0 %v701_v54 }
  0x45   :  { %645 = vmatprep.subr.bf16.mxu0 %v702_v55 }
  0x48   :  { %646 = vmatpush3.bf16.msra.mxu0 %v702_v55 }
  0x49   :  { %647 = vmatprep.subr.bf16.mxu0 %v703_v56 }
  0x4c   :  { %648 = vmatpush3.bf16.msra.mxu0 %v703_v56 }
  0xee   :  { %v603_v25 = vpop.f32.mrf.mxu0 }
  0xef   :  { %v187_v31 = vadd.f32 %v603_v25, %v518_v27 }
  0xf0   :  { %v178_v26 = vpop.f32.mrf.mxu0 }
  0xf1   :  { %v179_v29 = vadd.f32 %v518_v27, %v178_v26  ;;  %v211_v38 = vmax.f32 %v187_v31, 0.0 }
  0xf2   :  { %v604_v28 = vpop.f32.mrf.mxu0 }
  0xf3   :  { %v190_v30 = vadd.f32 %v604_v28, %v518_v27  ;;  %v209_v36 = vmax.f32 %v179_v29, 0.0 }
  0xf4   :  { %v181_v32 = vpop.f32.mrf.mxu0 }
  0xf5   :  { %v182_v33 = vadd.f32 %v518_v27, %v181_v32  ;;  %v212_v34 = vmax.f32 %v190_v30, 0.0 }
  0xf6   :  { %v607_v35 = vpop.f32.mrf.mxu0 }
  0xf7   :  { %v210_v37 = vmax.f32 %v182_v33, 0.0  ;;  %v218_v41 = vpack.c.bf16 %v212_v34, %v211_v38  ;;  %v203_v45 = vadd.f32 %v607_v35, %v518_v27 }
  0xf8   :  { %v194_v39 = vpop.f32.mrf.mxu0 }
  0xf9   :  { %v217_v40 = vpack.c.bf16 %v210_v37, %v209_v36  ;;  %v195_v43 = vadd.f32 %v518_v27, %v194_v39  ;;  %v215_v51 = vmax.f32 %v203_v45, 0.0 }
  0xfa   :  { %v608_v42 = vpop.f32.mrf.mxu0 }
  0xfb   :  { %v206_v44 = vadd.f32 %v608_v42, %v518_v27  ;;  %625 = vmatprep.mubr.bf16.mxu1 %v217_v40  ;;  %v213_v49 = vmax.f32 %v195_v43, 0.0 }
  0xfc   :  { %v197_v46 = vpop.f32.mrf.mxu0  ;;  %626 = vmatmul.mubr.bf16.vlgmr.msra.gmra.mxu1 %v218_v41 }
  0xfd   :  { %v198_v47 = vadd.f32 %v518_v27, %v197_v46  ;;  %665 = vmatpush3.bf16.msra.mxu1 %v696_v20  ;;  %v216_v48 = vmax.f32 %v206_v44, 0.0 }
  0xfe   :  { %658 = vmatprep.subr.bf16.mxu1 %v697_v21 }
  0xff   :  { %v214_v50 = vmax.f32 %v198_v47, 0.0  ;;  %v220_v53 = vpack.c.bf16 %v216_v48, %v215_v51 }
 0x101   :  { %v219_v52 = vpack.c.bf16 %v214_v50, %v213_v49  ;;  %666 = vmatpush3.bf16.msra.mxu1 %v697_v21 }
 0x102   :  { %659 = vmatprep.subr.bf16.mxu1 %v698_v22 }
 0x103   :  { %629 = vmatprep.mubr.bf16.mxu1 %v219_v52 }
 0x104   :  { %630 = vmatmul.mubr.bf16.gmra.mxu1 %v220_v53 }
 0x105   :  { %667 = vmatpush3.bf16.msra.mxu1 %v698_v22  ;;  %v540_v22 = vld [vmem:[%s871_s6] ss:$0 sm:$0xff] }
 0x106   :  { %660 = vmatprep.subr.bf16.mxu1 %v699_v23 }
 0x109   :  { %668 = vmatpush3.bf16.msra.mxu1 %v699_v23 }
 0x10a   :  { %661 = vmatprep.subr.bf16.mxu1 %v700_v24 }
 0x10d   :  { %669 = vmatpush3.bf16.msra.mxu1 %v700_v24 }
 0x10e   :  { %662 = vmatprep.subr.bf16.mxu1 %v701_v54 }
 0x111   :  { %670 = vmatpush3.bf16.msra.mxu1 %v701_v54 }
 0x112   :  { %663 = vmatprep.subr.bf16.mxu1 %v702_v55 }
 0x115   :  { %671 = vmatpush3.bf16.msra.mxu1 %v702_v55 }
 0x116   :  { %664 = vmatprep.subr.bf16.mxu1 %v703_v56 }
 0x119   :  { %672 = vmatpush3.bf16.msra.mxu1 %v703_v56 }
 0x1bc   :  { %v627_v57 = vpop.f32.mrf.mxu1 }
 0x1bd   :  { %v335_v63 = vadd.f32 %v627_v57, %v531_v59 }
 0x1be   :  { %v326_v58 = vpop.f32.mrf.mxu1 }
 0x1bf   :  { %v327_v61 = vadd.f32 %v531_v59, %v326_v58  ;;  %v359_v6 = vmax.f32 %v335_v63, 0.0 }
 0x1c0   :  { %v628_v60 = vpop.f32.mrf.mxu1 }
 0x1c1   :  { %v338_v62 = vadd.f32 %v628_v60, %v531_v59  ;;  %v357_v4 = vmax.f32 %v327_v61, 0.0 }
 0x1c2   :  { %v329_v0 = vpop.f32.mrf.mxu1 }
 0x1c3   :  { %v330_v1 = vadd.f32 %v531_v59, %v329_v0  ;;  %v360_v2 = vmax.f32 %v338_v62, 0.0 }
 0x1c4   :  { %v631_v3 = vpop.f32.mrf.mxu1 }
 0x1c5   :  { %v358_v5 = vmax.f32 %v330_v1, 0.0  ;;  %v366_v9 = vpack.c.bf16 %v360_v2, %v359_v6  ;;  %v351_v13 = vadd.f32 %v631_v3, %v531_v59 }
 0x1c6   :  { %v342_v7 = vpop.f32.mrf.mxu1 }
 0x1c7   :  { %v365_v8 = vpack.c.bf16 %v358_v5, %v357_v4  ;;  %v343_v11 = vadd.f32 %v531_v59, %v342_v7  ;;  %v363_v19 = vmax.f32 %v351_v13, 0.0 }
 0x1c8   :  { %v632_v10 = vpop.f32.mrf.mxu1 }
 0x1c9   :  { %v354_v12 = vadd.f32 %v632_v10, %v531_v59  ;;  %649 = vmatprep.mubr.bf16.mxu0 %v365_v8  ;;  %v361_v17 = vmax.f32 %v343_v11, 0.0 }
 0x1ca   :  { %v345_v14 = vpop.f32.mrf.mxu1  ;;  %650 = vmatmul.mubr.bf16.vlgmr.msra.gmra.mxu0 %v366_v9 }
 0x1cb   :  { %v346_v15 = vadd.f32 %v531_v59, %v345_v14  ;;  %v364_v16 = vmax.f32 %v354_v12, 0.0 }
 0x1cd   :  { %v362_v18 = vmax.f32 %v346_v15, 0.0  ;;  %v368_v21 = vpack.c.bf16 %v364_v16, %v363_v19 }
 0x1cf   :  { %v367_v20 = vpack.c.bf16 %v362_v18, %v361_v17 }
 0x1d1   :  { %653 = vmatprep.mubr.bf16.mxu1 %v367_v20 }
 0x1d2   :  { %654 = vmatmul.mubr.bf16.vlgmr.msra.gmra.mxu1 %v368_v21 }
 0x28a   :  { %v651_v23 = vpop.f32.mrf.mxu0 }
 0x28b   :  { %v483_v24 = vadd.f32 %v651_v23, %v540_v22 }
 0x28c   :  { %v474_v25 = vpop.f32.mrf.mxu0 }
 0x28d   :  { %507 = vst [vmem:[%s872_s7 + $0x10] sm:$0xff] %v483_v24  ;;  %v475_v26 = vadd.f32 %v540_v22, %v474_v25 }
 0x28e   :  { %v652_v27 = vpop.f32.mrf.mxu0 }
 0x28f   :  { %505 = vst [vmem:[%s872_s7] sm:$0xff] %v475_v26  ;;  %v486_v28 = vadd.f32 %v652_v27, %v540_v22 }
 0x290   :  { %v477_v29 = vpop.f32.mrf.mxu0 }
 0x291   :  { %508 = vst [vmem:[%s872_s7 + $0x18] sm:$0xff] %v486_v28  ;;  %v478_v30 = vadd.f32 %v540_v22, %v477_v29 }
 0x292   :  { %v655_v31 = vpop.f32.mrf.mxu1 }
 0x293   :  { %506 = vst [vmem:[%s872_s7 + $0x8] sm:$0xff] %v478_v30  ;;  %v499_v32 = vadd.f32 %v655_v31, %v540_v22 }
 0x294   :  { %v490_v33 = vpop.f32.mrf.mxu1 }
 0x295   :  { %511 = vst [vmem:[%s872_s7 + $0x30] sm:$0xff] %v499_v32  ;;  %v491_v34 = vadd.f32 %v540_v22, %v490_v33 }
 0x296   :  { %v656_v35 = vpop.f32.mrf.mxu1 }
 0x297   :  { %509 = vst [vmem:[%s872_s7 + $0x20] sm:$0xff] %v491_v34  ;;  %v502_v36 = vadd.f32 %v656_v35, %v540_v22 }
 0x298   :  { %v493_v37 = vpop.f32.mrf.mxu1 }
 0x299   :  { %512 = vst [vmem:[%s872_s7 + $0x38] sm:$0xff] %v502_v36  ;;  %v494_v38 = vadd.f32 %v540_v22, %v493_v37 }
 0x29b   :  { %510 = vst [vmem:[%s872_s7 + $0x28] sm:$0xff] %v494_v38 }
 0x29c   :  { %517 = vsyncpa [#allocation3], 1 }

</bundles_post_ra>
